<compile_context>
chip_gen: v5e
topology: v5e:2x2
jax: 0.10.0
libtpu: 0.0.40
codegen_flags: <defaults>
</compile_context>

<pallas_src>
import math

import jax
import jax.numpy as jnp
from jax.experimental import pallas as pl
from jax.experimental.pallas import tpu as pltpu

_EPS = 1e-5
_TARGET_BLOCK_BYTES = 2 << 20  # ~2 MiB of input per grid step


def _sublane_multiple(dtype) -> int:
    itemsize = jnp.dtype(dtype).itemsize
    if itemsize >= 4:
        return 8
    if itemsize == 2:
        return 16
    return 32


def _biasfree_ln_kernel(x_ref, w_ref, o_ref):
    # x_ref: (TILE_R, C)   w_ref: (1, C)   o_ref: (TILE_R, C)
    x = x_ref[...].astype(jnp.float32)
    mu = jnp.mean(x, axis=-1, keepdims=True)
    xc = x - mu
    var = jnp.mean(xc * xc, axis=-1, keepdims=True)      # unbiased=False (divide by C)
    inv = jax.lax.rsqrt(var + _EPS)                       # EUP rsqrt
    w = w_ref[...].astype(jnp.float32)                    # (1, C) broadcasts over rows
    # BiasFree: scale the ORIGINAL x (not the centered x).
    o_ref[...] = (x * inv * w).astype(o_ref.dtype)


def _pick_tile_rows(R: int, C: int, dtype) -> int:
    """Largest row-tile within the byte budget, aligned to the sublane multiple,
    while keeping >= 2 grid blocks whenever the problem is big enough (v7x megacore)."""
    sub = _sublane_multiple(dtype)
    row_bytes = C * jnp.dtype(dtype).itemsize
    budget_rows = max(sub, (_TARGET_BLOCK_BYTES // max(row_bytes, 1)) // sub * sub)

    if R > budget_rows:
        return budget_rows                      # >= 2 blocks automatically
    if R >= 2 * sub:
        # Whole problem fits in one budget-sized block: split it in two so both
        # TensorCores get work on v7x. (half < R is guaranteed for R >= 2*sub.)
        half = -(-(-(-R // 2)) // sub) * sub    # round_up(ceil(R/2), sub)
        return half
    # Tiny problem: single full-extent block (block dims == array dims is always legal).
    return R


def biasfree_layernorm(x, weight):
    """x: (..., C); weight: (C,). Normalizes over the last dim (biased var), bias-free."""
    orig_shape = x.shape
    C = orig_shape[-1]
    R = math.prod(orig_shape[:-1]) if len(orig_shape) > 1 else 1

    x2 = x.reshape(R, C)
    w2 = weight.reshape(1, C)

    tile_r = _pick_tile_rows(R, C, x.dtype)
    n_blocks = pl.cdiv(R, tile_r)               # partial final block handled by Pallas

    out = pl.pallas_call(
        _biasfree_ln_kernel,
        out_shape=jax.ShapeDtypeStruct((R, C), x.dtype),
        grid_spec=pltpu.PrefetchScalarGridSpec(
            num_scalar_prefetch=0,
            grid=(n_blocks,),
            in_specs=[
                pl.BlockSpec((tile_r, C), lambda i: (i, 0)),
                pl.BlockSpec((1, C), lambda i: (0, 0)),   # constant -> stays resident
            ],
            out_specs=pl.BlockSpec((tile_r, C), lambda i: (i, 0)),
        ),
        compiler_params=pltpu.CompilerParams(
            dimension_semantics=("parallel",),
            vmem_limit_bytes=32 << 20,
        ),
    )(x2, w2)

    return out.reshape(orig_shape)


def _reference(x, weight):
    var = jnp.var(x.astype(jnp.float32), axis=-1, keepdims=True)  # ddof=0 == unbiased=False
    y = x.astype(jnp.float32) / jnp.sqrt(var + _EPS) * weight.astype(jnp.float32)
    return y.astype(x.dtype)


if __name__ == "__main__":
    key = jax.random.PRNGKey(0)
    k_x, k_w, k_x2 = jax.random.split(key, 3)

    # Restormer-style usage: tokens = (B, H*W, C) with C = normalized_shape.
    B, HW, C = 2, 16 * 16, 48
    x = jax.random.normal(k_x, (B, HW, C), dtype=jnp.float32)
    # Module initializes weight to ones; perturb it to exercise the scale path.
    w = 1.0 + 0.1 * jax.random.normal(k_w, (C,), dtype=jnp.float32)

    fn = jax.jit(biasfree_layernorm)

    out = jax.block_until_ready(fn(x, w))
    ref = _reference(x, w)
    assert out.shape == x.shape, out.shape
    assert jnp.allclose(out, ref, atol=1e-4, rtol=1e-4), float(jnp.max(jnp.abs(out - ref)))

    # Second shape whose row count does NOT divide the tile: exercises the
    # partial-final-block path (no jnp.pad / [:R] slicing in the wrapper).
    xb = jax.random.normal(k_x2, (3, 100, C), dtype=jnp.float32)
    outb = jax.block_until_ready(fn(xb, w))
    refb = _reference(xb, w)
    assert outb.shape == xb.shape, outb.shape
    assert jnp.allclose(outb, refb, atol=1e-4, rtol=1e-4), float(jnp.max(jnp.abs(outb - refb)))

    print("KERNEL_OK")
</pallas_src>

<mosaic_0001>
module attributes {stable_mosaic.version = 11 : i64} {
  func.func @_biasfree_ln_kernel(%arg0: i32, %arg1: memref<256x48xf32, #tpu.memory_space<vmem>>, %arg2: memref<1x48xf32, #tpu.memory_space<vmem>>, %arg3: memref<256x48xf32, #tpu.memory_space<vmem>>) attributes {dimension_semantics = [#tpu.dimension_semantics<parallel>], iteration_bounds = array<i64: 2>, scalar_prefetch = 0 : i64, scratch_operands = 0 : i64, tpu.core_type = #tpu.core_type<tc>, window_params = [{transform_indices = @transform_0, window_bounds = array<i64: 256, 48>}, {pipeline_mode = #tpu.pipeline_mode<synchronous>, transform_indices = @transform_1, window_bounds = array<i64: 1, 48>}, {transform_indices = @transform_2, window_bounds = array<i64: 256, 48>}]} {
    %c0 = arith.constant 0 : index
    %c0_0 = arith.constant 0 : index
    %0 = vector.load %arg1[%c0, %c0_0] : memref<256x48xf32, #tpu.memory_space<vmem>>, vector<256x48xf32>
    %cst = arith.constant dense<0.000000e+00> : vector<256xf32>
    %1 = vector.multi_reduction <add>, %0, %cst [1] : vector<256x48xf32> to vector<256xf32>
    %2 = vector.shape_cast %1 : vector<256xf32> to vector<256x1xf32>
    %cst_1 = arith.constant 4.800000e+01 : f32
    %3 = vector.broadcast %cst_1 : f32 to vector<256x1xf32>
    %4 = arith.divf %2, %3 : vector<256x1xf32>
    %5 = vector.broadcast %4 : vector<256x1xf32> to vector<256x48xf32>
    %6 = arith.subf %0, %5 : vector<256x48xf32>
    %7 = arith.mulf %6, %6 : vector<256x48xf32>
    %cst_2 = arith.constant dense<0.000000e+00> : vector<256xf32>
    %8 = vector.multi_reduction <add>, %7, %cst_2 [1] : vector<256x48xf32> to vector<256xf32>
    %9 = vector.shape_cast %8 : vector<256xf32> to vector<256x1xf32>
    %cst_3 = arith.constant 4.800000e+01 : f32
    %10 = vector.broadcast %cst_3 : f32 to vector<256x1xf32>
    %11 = arith.divf %9, %10 : vector<256x1xf32>
    %cst_4 = arith.constant 9.99999974E-6 : f32
    %12 = vector.broadcast %cst_4 : f32 to vector<256x1xf32>
    %13 = arith.addf %11, %12 : vector<256x1xf32>
    %14 = math.rsqrt %13 : vector<256x1xf32>
    %c0_5 = arith.constant 0 : index
    %c0_6 = arith.constant 0 : index
    %15 = vector.load %arg2[%c0_5, %c0_6] : memref<1x48xf32, #tpu.memory_space<vmem>>, vector<1x48xf32>
    %16 = vector.broadcast %14 : vector<256x1xf32> to vector<256x48xf32>
    %17 = arith.mulf %0, %16 : vector<256x48xf32>
    %18 = vector.broadcast %15 : vector<1x48xf32> to vector<256x48xf32>
    %19 = arith.mulf %17, %18 : vector<256x48xf32>
    %c0_7 = arith.constant 0 : index
    %c0_8 = arith.constant 0 : index
    %20 = vector.load %arg3[%c0_7, %c0_8] : memref<256x48xf32, #tpu.memory_space<vmem>>, vector<256x48xf32>
    tpu.vector_store %arg3[%c0_7, %c0_8], %19 {strides = array<i32>} : memref<256x48xf32, #tpu.memory_space<vmem>>, vector<256x48xf32>,
    return
  }
  func.func @transform_0(%arg0: i32) -> (i32, i32) {
    %c0_i32 = arith.constant 0 : i32
    %c0_i32_0 = arith.constant 0 : i32
    return %arg0, %c0_i32 : i32, i32
  }
  func.func @transform_1(%arg0: i32) -> (i32, i32) {
    %c0_i32 = arith.constant 0 : i32
    %c0_i32_0 = arith.constant 0 : i32
    %c0_i32_1 = arith.constant 0 : i32
    return %c0_i32, %c0_i32_0 : i32, i32
  }
  func.func @transform_2(%arg0: i32) -> (i32, i32) {
    %c0_i32 = arith.constant 0 : i32
    %c0_i32_0 = arith.constant 0 : i32
    return %arg0, %c0_i32 : i32, i32
  }
}

</mosaic_0001>

<bundles_post_ra>
// kernel: biasfree_layernorm.1
= control target key start
LH: loop header
LB: loop body
LE: loop exit
PB: predicated region body
PF: predicated region fallthrough
CT: control target
= control target key end

     0   :  { %s1147_s9 = smov 0   ;;  %s2056_s0 = inlined_call_operand.vmem [shape: f32[512,48], index: 0, kind: input, shape index: {}]   ;;  %s2057_s1 = inlined_call_operand.vmem [shape: f32[1,48], index: 1, kind: input, shape index: {}]   ;;  %s2058_s2 = inlined_call_operand.vmem [shape: f32[512,48], index: 2, kind: output, shape index: {}]  }
   0x1 LB: > { %s1015_s10 = sadd.s32 4294967295, %s1129_s9   ;;  %p1019_p0 = scmp.ge.s32.totalorder %s1129_s9, 1  ;;  %s1129_s9 = sphi %s1147_s9, %s12_s9  }
   0x2   : > { %p113_p1 = scmp.lt.s32.totalorder %s1129_s9, 3 }
   0x4   : > { %p114_p2 = pnand %p1019_p0, %p113_p1 }
   0x5   : > { %s1020_s11 = sshll.u32 (!%p114_p2), %s1015_s10, 5 }
   0x6   : > { %117 = sbr.rel (%p114_p2) target bundleno = 385 (0x181), region = 28  ;;  %p136_p3 = scmp.lt.s32.totalorder (!%p114_p2), %s1020_s11, 63 }
   0xb   : > { %s2082_s11 = smov (!%p136_p3, %s1020_s11), 63  ;;  %vm179_vm0 = vcmask 392192  }
   0xc   : > { %s1021_s12 = sshll.u32 %s2082_s11, 3 }
   0xd   : > { %s1163_s15 = scalar_lea.vmem %s2056_s0, %s1021_s12  ;;  %s1478_s20 = scalar_lea.vmem %s2058_s2, %s1021_s12 }
   0xe   : > { %v1166_v0 = vld [vmem:[%s1163_s15 + $0x10] sm:$0xff]  ;;  %v1169_v1 = vld [vmem:[%s1163_s15] sm:$0xff]  ;;  %v1181_v6 = vld [vmem:[%s1163_s15 + $0x18] sm:$0xff] }
   0xf   : > { %v1172_v2 = vld [vmem:[%s1163_s15 + $0x20] sm:$0xff]  ;;  %v186_v3 = vsel %vm179_vm0, %v1166_v0, 0.0  ;;  %v180_v4 = vsel %vm179_vm0, %v1169_v1, 0.0  ;;  %v1184_v7 = vld [vmem:[%s1163_s15 + $0x8] sm:$0xff]  ;;  %v189_v9 = vsel %vm179_vm0, %v1181_v6, 0.0  ;;  %v1196_v12 = vld [vmem:[%s1163_s15 + $0x30] sm:$0xff] }
  0x10   : > { %v192_v5 = vsel %vm179_vm0, %v1172_v2, 0.0  ;;  %187 = vadd.xlane.f32.xlu1 %v186_v3  ;;  %181 = vadd.xlane.f32.xlu0 %v180_v4  ;;  %v1187_v8 = vld [vmem:[%s1163_s15 + $0x28] sm:$0xff]  ;;  %v183_v10 = vsel %vm179_vm0, %v1184_v7, 0.0  ;;  %v1199_v13 = vld [vmem:[%s1163_s15 + $0x38] sm:$0xff]  ;;  %v1202_v14 = vld [vmem:[%s1163_s15 + $0x40] sm:$0xff]  ;;  %v198_v15 = vsel %vm179_vm0, %v1196_v12, 0.0 }
  0x11   : > { %193 = vadd.xlane.f32.xlu2 %v192_v5  ;;  %v195_v11 = vsel %vm179_vm0, %v1187_v8, 0.0  ;;  %v201_v16 = vsel %vm179_vm0, %v1199_v13, 0.0  ;;  %v204_v17 = vsel %vm179_vm0, %v1202_v14, 0.0  ;;  %v1211_v18 = vld [vmem:[%s1163_s15 + $0x48] sm:$0xff]  ;;  %v1214_v19 = vld [vmem:[%s1163_s15 + $0x50] sm:$0xff]  ;;  %v1217_v20 = vld [vmem:[%s1163_s15 + $0x58] sm:$0xff] }
  0x12   : > { %v207_v21 = vsel %vm179_vm0, %v1211_v18, 0.0  ;;  %v210_v22 = vsel %vm179_vm0, %v1214_v19, 0.0  ;;  %v213_v23 = vsel %vm179_vm0, %v1217_v20, 0.0  ;;  %v1226_v24 = vld [vmem:[%s1163_s15 + $0x60] sm:$0xff]  ;;  %v1229_v25 = vld [vmem:[%s1163_s15 + $0x68] sm:$0xff]  ;;  %v1232_v26 = vld [vmem:[%s1163_s15 + $0x70] sm:$0xff] }
  0x13   : > { %v216_v27 = vsel %vm179_vm0, %v1226_v24, 0.0  ;;  %v219_v28 = vsel %vm179_vm0, %v1229_v25, 0.0  ;;  %v222_v29 = vsel %vm179_vm0, %v1232_v26, 0.0  ;;  %v1241_v30 = vld [vmem:[%s1163_s15 + $0x78] sm:$0xff]  ;;  %v1244_v31 = vld [vmem:[%s1163_s15 + $0x80] sm:$0xff]  ;;  %v1247_v32 = vld [vmem:[%s1163_s15 + $0x88] sm:$0xff] }
  0x14   : > { %v225_v33 = vsel %vm179_vm0, %v1241_v30, 0.0  ;;  %v228_v34 = vsel %vm179_vm0, %v1244_v31, 0.0  ;;  %v231_v35 = vsel %vm179_vm0, %v1247_v32, 0.0  ;;  %v1256_v36 = vld [vmem:[%s1163_s15 + $0x90] sm:$0xff]  ;;  %v1259_v37 = vld [vmem:[%s1163_s15 + $0x98] sm:$0xff]  ;;  %v1262_v38 = vld [vmem:[%s1163_s15 + $0xa0] sm:$0xff] }
  0x15   : > { %v234_v39 = vsel %vm179_vm0, %v1256_v36, 0.0  ;;  %v237_v40 = vsel %vm179_vm0, %v1259_v37, 0.0  ;;  %v240_v41 = vsel %vm179_vm0, %v1262_v38, 0.0  ;;  %v1271_v42 = vld [vmem:[%s1163_s15 + $0xa8] sm:$0xff]  ;;  %v1274_v43 = vld [vmem:[%s1163_s15 + $0xb0] sm:$0xff]  ;;  %v1277_v44 = vld [vmem:[%s1163_s15 + $0xb8] sm:$0xff] }
  0x16   : > { %v243_v45 = vsel %vm179_vm0, %v1271_v42, 0.0  ;;  %v246_v46 = vsel %vm179_vm0, %v1274_v43, 0.0  ;;  %v249_v47 = vsel %vm179_vm0, %v1277_v44, 0.0  ;;  %v1286_v48 = vld [vmem:[%s1163_s15 + $0xc0] sm:$0xff]  ;;  %v1289_v49 = vld [vmem:[%s1163_s15 + $0xc8] sm:$0xff]  ;;  %v1292_v50 = vld [vmem:[%s1163_s15 + $0xd0] sm:$0xff] }
  0x17   : > { %v252_v51 = vsel %vm179_vm0, %v1286_v48, 0.0  ;;  %v255_v52 = vsel %vm179_vm0, %v1289_v49, 0.0  ;;  %v258_v53 = vsel %vm179_vm0, %v1292_v50, 0.0  ;;  %v1301_v54 = vld [vmem:[%s1163_s15 + $0xd8] sm:$0xff]  ;;  %v1304_v55 = vld [vmem:[%s1163_s15 + $0xe0] sm:$0xff]  ;;  %v1307_v56 = vld [vmem:[%s1163_s15 + $0xe8] sm:$0xff] }
  0x18   : > { %190 = vadd.xlane.f32.xlu1 %v189_v9  ;;  %184 = vadd.xlane.f32.xlu0 %v183_v10  ;;  %v261_v57 = vsel %vm179_vm0, %v1301_v54, 0.0  ;;  %v264_v58 = vsel %vm179_vm0, %v1304_v55, 0.0  ;;  %v267_v59 = vsel %vm179_vm0, %v1307_v56, 0.0  ;;  %v1316_v60 = vld [vmem:[%s1163_s15 + $0xf0] sm:$0xff]  ;;  %v1319_v61 = vld [vmem:[%s1163_s15 + $0xf8] sm:$0xff]  ;;  %v1131_v3 = vmov 48.0  }
  0x19   : > { %196 = vadd.xlane.f32.xlu2 %v195_v11  ;;  %v270_v62 = vsel %vm179_vm0, %v1316_v60, 0.0  ;;  %v273_v63 = vsel %vm179_vm0, %v1319_v61, 0.0  ;;  %1036 = vrcp.f32 %v1131_v3 }
  0x1f   : > { %v1037_v4 = vpop.eup %1036 }
  0x20   : > { %199 = vadd.xlane.f32.xlu0 %v198_v15  ;;  %202 = vadd.xlane.f32.xlu1 %v201_v16  ;;  %v277_v5 = vmul.f32 48.0, %v1037_v4  ;;  %vm281_vm1 = vweird.f32 %v1037_v4 }
  0x21   : > { %205 = vadd.xlane.f32.xlu2 %v204_v17 }
  0x22   : > { %v278_v9 = vsub.f32 1.0, %v277_v5 }
  0x24   : > { %v279_v10 = vmul.f32 %v1037_v4, %v278_v9 }
  0x26   : > { %v280_v11 = vadd.f32 %v1037_v4, %v279_v10 }
  0x28   : > { %208 = vadd.xlane.f32.xlu0 %v207_v21  ;;  %211 = vadd.xlane.f32.xlu1 %v210_v22  ;;  %v1325_v15 = vsel %vm281_vm1, %v1037_v4, %v280_v11 }
  0x29   : > { %214 = vadd.xlane.f32.xlu2 %v213_v23 }
  0x30   : > { %217 = vadd.xlane.f32.xlu0 %v216_v27  ;;  %220 = vadd.xlane.f32.xlu1 %v219_v28 }
  0x31   : > { %223 = vadd.xlane.f32.xlu2 %v222_v29 }
  0x38   : > { %226 = vadd.xlane.f32.xlu0 %v225_v33  ;;  %229 = vadd.xlane.f32.xlu1 %v228_v34 }
  0x39   : > { %232 = vadd.xlane.f32.xlu2 %v231_v35 }
  0x40   : > { %235 = vadd.xlane.f32.xlu0 %v234_v39  ;;  %238 = vadd.xlane.f32.xlu1 %v237_v40 }
  0x41   : > { %241 = vadd.xlane.f32.xlu2 %v240_v41 }
  0x48   : > { %244 = vadd.xlane.f32.xlu0 %v243_v45  ;;  %247 = vadd.xlane.f32.xlu1 %v246_v46 }
  0x49   : > { %250 = vadd.xlane.f32.xlu2 %v249_v47 }
  0x50   : > { %253 = vadd.xlane.f32.xlu0 %v252_v51  ;;  %256 = vadd.xlane.f32.xlu1 %v255_v52 }
  0x51   : > { %259 = vadd.xlane.f32.xlu2 %v258_v53 }
  0x58   : > { %262 = vadd.xlane.f32.xlu0 %v261_v57  ;;  %265 = vadd.xlane.f32.xlu1 %v264_v58 }
  0x59   : > { %268 = vadd.xlane.f32.xlu2 %v267_v59 }
  0x60   : > { %271 = vadd.xlane.f32.xlu0 %v270_v62  ;;  %274 = vadd.xlane.f32.xlu1 %v273_v63 }
  0x83   : > { %v188_v16 = vpop.xlane.xlu1 %187  ;;  %v182_v17 = vpop.xlane.xlu0 %181 }
  0x84   : > { %v285_v21 = vmul.f32 %v1325_v15, %v188_v16  ;;  %v283_v22 = vmul.f32 %v1325_v15, %v182_v17  ;;  %v194_v23 = vpop.xlane.xlu2 %193 }
  0x85   : > { %v287_v41 = vmul.f32 %v1325_v15, %v194_v23 }
  0x86   : > { %v317_v27 = vsub.f32 %v1166_v0, %v285_v21  ;;  %v315_v28 = vsub.f32 %v1169_v1, %v283_v22 }
  0x87   : > { %v319_v58 = vsub.f32 %v1172_v2, %v287_v41 }
  0x88   : > { %v349_v29 = vmul.f32 %v317_v27, %v317_v27  ;;  %v347_v33 = vmul.f32 %v315_v28, %v315_v28 }
  0x89   : > { %v351_v21 = vmul.f32 %v319_v58, %v319_v58 }
  0x8a   : > { %v385_v34 = vsel %vm179_vm0, %v349_v29, 0.0  ;;  %v379_v35 = vsel %vm179_vm0, %v347_v33, 0.0 }
  0x8b   : > { %386 = vadd.xlane.f32.xlu1 %v385_v34  ;;  %v191_v39 = vpop.xlane.xlu1 %190  ;;  %380 = vadd.xlane.f32.xlu2 %v379_v35  ;;  %v185_v40 = vpop.xlane.xlu0 %184  ;;  %v391_v29 = vsel %vm179_vm0, %v351_v21, 0.0 }
  0x8c   : > { %v286_v45 = vmul.f32 %v1325_v15, %v191_v39  ;;  %v284_v46 = vmul.f32 %v1325_v15, %v185_v40  ;;  %v197_v47 = vpop.xlane.xlu2 %196 }
  0x8d   : > { %v288_v51 = vmul.f32 %v1325_v15, %v197_v47 }
  0x8e   : > { %v318_v52 = vsub.f32 %v1181_v6, %v286_v45  ;;  %v316_v53 = vsub.f32 %v1184_v7, %v284_v46 }
  0x8f   : > { %v320_v57 = vsub.f32 %v1187_v8, %v288_v51 }
  0x90   : > { %v350_v59 = vmul.f32 %v318_v52, %v318_v52  ;;  %v348_v62 = vmul.f32 %v316_v53, %v316_v53 }
  0x91   : > { %v352_v63 = vmul.f32 %v320_v57, %v320_v57 }
  0x92   : > { %v388_v3 = vsel %vm179_vm0, %v350_v59, 0.0  ;;  %v382_v4 = vsel %vm179_vm0, %v348_v62, 0.0 }
  0x93   : > { %389 = vadd.xlane.f32.xlu2 %v388_v3  ;;  %383 = vadd.xlane.f32.xlu0 %v382_v4  ;;  %v200_v5 = vpop.xlane.xlu0 %199  ;;  %v394_v9 = vsel %vm179_vm0, %v352_v63, 0.0  ;;  %v203_v10 = vpop.xlane.xlu1 %202 }
  0x94   : > { %v289_v11 = vmul.f32 %v1325_v15, %v200_v5  ;;  %v206_v16 = vpop.xlane.xlu2 %205  ;;  %395 = vadd.xlane.f32.xlu1 %v394_v9  ;;  %v290_v17 = vmul.f32 %v1325_v15, %v203_v10 }
  0x95   : > { %v291_v22 = vmul.f32 %v1325_v15, %v206_v16 }
  0x96   : > { %v321_v23 = vsub.f32 %v1196_v12, %v289_v11  ;;  %v322_v28 = vsub.f32 %v1199_v13, %v290_v17 }
  0x97   : > { %v323_v27 = vsub.f32 %v1202_v14, %v291_v22 }
  0x98   : > { %v353_v33 = vmul.f32 %v321_v23, %v321_v23  ;;  %v354_v51 = vmul.f32 %v322_v28, %v322_v28 }
  0x99   : > { %v355_v34 = vmul.f32 %v323_v27, %v323_v27 }
  0x9a   : > { %v397_v35 = vsel %vm179_vm0, %v353_v33, 0.0  ;;  %v400_v59 = vsel %vm179_vm0, %v354_v51, 0.0 }
  0x9b   : > { %392 = vadd.xlane.f32.xlu0 %v391_v29  ;;  %398 = vadd.xlane.f32.xlu2 %v397_v35  ;;  %v209_v39 = vpop.xlane.xlu0 %208  ;;  %v403_v40 = vsel %vm179_vm0, %v355_v34, 0.0  ;;  %v212_v41 = vpop.xlane.xlu1 %211 }
  0x9c   : > { %v292_v45 = vmul.f32 %v1325_v15, %v209_v39  ;;  %v215_v46 = vpop.xlane.xlu2 %214  ;;  %404 = vadd.xlane.f32.xlu1 %v403_v40  ;;  %v293_v47 = vmul.f32 %v1325_v15, %v212_v41 }
  0x9d   : > { %v294_v52 = vmul.f32 %v1325_v15, %v215_v46 }
  0x9e   : > { %v324_v53 = vsub.f32 %v1211_v18, %v292_v45  ;;  %v325_v58 = vsub.f32 %v1214_v19, %v293_v47 }
  0x9f   : > { %v326_v57 = vsub.f32 %v1217_v20, %v294_v52 }
  0xa0   : > { %v356_v62 = vmul.f32 %v324_v53, %v324_v53  ;;  %v357_v17 = vmul.f32 %v325_v58, %v325_v58 }
  0xa1   : > { %v358_v63 = vmul.f32 %v326_v57, %v326_v57 }
  0xa2   : > { %v406_v3 = vsel %vm179_vm0, %v356_v62, 0.0  ;;  %v409_v27 = vsel %vm179_vm0, %v357_v17, 0.0 }
  0xa3   : > { %401 = vadd.xlane.f32.xlu0 %v400_v59  ;;  %407 = vadd.xlane.f32.xlu2 %v406_v3  ;;  %v218_v4 = vpop.xlane.xlu0 %217  ;;  %v412_v5 = vsel %vm179_vm0, %v358_v63, 0.0  ;;  %v221_v9 = vpop.xlane.xlu1 %220 }
  0xa4   : > { %v295_v10 = vmul.f32 %v1325_v15, %v218_v4  ;;  %v224_v11 = vpop.xlane.xlu2 %223  ;;  %413 = vadd.xlane.f32.xlu1 %v412_v5  ;;  %v296_v16 = vmul.f32 %v1325_v15, %v221_v9 }
  0xa5   : > { %v297_v19 = vmul.f32 %v1325_v15, %v224_v11 }
  0xa6   : > { %v327_v21 = vsub.f32 %v1226_v24, %v295_v10  ;;  %v328_v23 = vsub.f32 %v1229_v25, %v296_v16 }
  0xa7   : > { %v329_v22 = vsub.f32 %v1232_v26, %v297_v19 }
  0xa8   : > { %v359_v28 = vmul.f32 %v327_v21, %v327_v21  ;;  %v360_v26 = vmul.f32 %v328_v23, %v328_v23 }
  0xa9   : > { %v361_v29 = vmul.f32 %v329_v22, %v329_v22 }
  0xaa   : > { %v415_v33 = vsel %vm179_vm0, %v359_v28, 0.0  ;;  %v418_v51 = vsel %vm179_vm0, %v360_v26, 0.0 }
  0xab   : > { %410 = vadd.xlane.f32.xlu0 %v409_v27  ;;  %416 = vadd.xlane.f32.xlu2 %v415_v33  ;;  %v227_v34 = vpop.xlane.xlu0 %226  ;;  %v421_v35 = vsel %vm179_vm0, %v361_v29, 0.0  ;;  %v230_v39 = vpop.xlane.xlu1 %229 }
  0xac   : > { %v298_v40 = vmul.f32 %v1325_v15, %v227_v34  ;;  %v233_v41 = vpop.xlane.xlu2 %232  ;;  %422 = vadd.xlane.f32.xlu1 %v421_v35  ;;  %v299_v24 = vmul.f32 %v1325_v15, %v230_v39 }
  0xad   : > { %v300_v25 = vmul.f32 %v1325_v15, %v233_v41 }
  0xae   : > { %v330_v45 = vsub.f32 %v1241_v30, %v298_v40  ;;  %v331_v47 = vsub.f32 %v1244_v31, %v299_v24 }
  0xaf   : > { %v332_v46 = vsub.f32 %v1247_v32, %v300_v25 }
  0xb0   : > { %v362_v52 = vmul.f32 %v330_v45, %v330_v45  ;;  %v363_v32 = vmul.f32 %v331_v47, %v331_v47 }
  0xb1   : > { %v364_v53 = vmul.f32 %v332_v46, %v332_v46 }
  0xb2   : > { %v424_v57 = vsel %vm179_vm0, %v362_v52, 0.0  ;;  %v427_v10 = vsel %vm179_vm0, %v363_v32, 0.0 }
  0xb3   : > { %419 = vadd.xlane.f32.xlu0 %v418_v51  ;;  %425 = vadd.xlane.f32.xlu2 %v424_v57  ;;  %v236_v58 = vpop.xlane.xlu0 %235  ;;  %v430_v59 = vsel %vm179_vm0, %v364_v53, 0.0  ;;  %v239_v62 = vpop.xlane.xlu1 %238 }
  0xb4   : > { %v301_v63 = vmul.f32 %v1325_v15, %v236_v58  ;;  %v242_v3 = vpop.xlane.xlu2 %241  ;;  %431 = vadd.xlane.f32.xlu1 %v430_v59  ;;  %v302_v30 = vmul.f32 %v1325_v15, %v239_v62 }
  0xb5   : > { %v303_v31 = vmul.f32 %v1325_v15, %v242_v3 }
  0xb6   : > { %v333_v4 = vsub.f32 %v1256_v36, %v301_v63  ;;  %v334_v9 = vsub.f32 %v1259_v37, %v302_v30 }
  0xb7   : > { %v335_v5 = vsub.f32 %v1262_v38, %v303_v31 }
  0xb8   : > { %v365_v11 = vmul.f32 %v333_v4, %v333_v4  ;;  %v366_v38 = vmul.f32 %v334_v9, %v334_v9 }
  0xb9   : > { %v367_v16 = vmul.f32 %v335_v5, %v335_v5 }
  0xba   : > { %v433_v17 = vsel %vm179_vm0, %v365_v11, 0.0  ;;  %v436_v34 = vsel %vm179_vm0, %v366_v38, 0.0 }
  0xbb   : > { %428 = vadd.xlane.f32.xlu0 %v427_v10  ;;  %434 = vadd.xlane.f32.xlu2 %v433_v17  ;;  %v245_v19 = vpop.xlane.xlu0 %244  ;;  %v439_v21 = vsel %vm179_vm0, %v367_v16, 0.0  ;;  %v248_v22 = vpop.xlane.xlu1 %247 }
  0xbc   : > { %v304_v23 = vmul.f32 %v1325_v15, %v245_v19  ;;  %v251_v27 = vpop.xlane.xlu2 %250  ;;  %440 = vadd.xlane.f32.xlu1 %v439_v21  ;;  %v305_v36 = vmul.f32 %v1325_v15, %v248_v22 }
  0xbd   : > { %v306_v37 = vmul.f32 %v1325_v15, %v251_v27 }
  0xbe   : > { %v336_v28 = vsub.f32 %v1271_v42, %v304_v23  ;;  %v337_v33 = vsub.f32 %v1274_v43, %v305_v36 }
  0xbf   : > { %v338_v29 = vsub.f32 %v1277_v44, %v306_v37 }
  0xc0   : > { %v368_v35 = vmul.f32 %v336_v28, %v336_v28  ;;  %v369_v44 = vmul.f32 %v337_v33, %v337_v33 }
  0xc1   : > { %v370_v39 = vmul.f32 %v338_v29, %v338_v29 }
  0xc2   : > { %v442_v40 = vsel %vm179_vm0, %v368_v35, 0.0  ;;  %v445_v52 = vsel %vm179_vm0, %v369_v44, 0.0 }
  0xc3   : > { %437 = vadd.xlane.f32.xlu0 %v436_v34  ;;  %443 = vadd.xlane.f32.xlu2 %v442_v40  ;;  %v254_v41 = vpop.xlane.xlu0 %253  ;;  %v448_v24 = vsel %vm179_vm0, %v370_v39, 0.0  ;;  %v257_v26 = vpop.xlane.xlu1 %256 }
  0xc4   : > { %v307_v25 = vmul.f32 %v1325_v15, %v254_v41  ;;  %v260_v45 = vpop.xlane.xlu2 %259  ;;  %449 = vadd.xlane.f32.xlu1 %v448_v24  ;;  %v308_v42 = vmul.f32 %v1325_v15, %v257_v26 }
  0xc5   : > { %v309_v43 = vmul.f32 %v1325_v15, %v260_v45 }
  0xc6   : > { %v339_v46 = vsub.f32 %v1286_v48, %v307_v25  ;;  %v340_v51 = vsub.f32 %v1289_v49, %v308_v42 }
  0xc7   : > { %v341_v47 = vsub.f32 %v1292_v50, %v309_v43 }
  0xc8   : > { %v371_v53 = vmul.f32 %v339_v46, %v339_v46  ;;  %v372_v50 = vmul.f32 %v340_v51, %v340_v51 }
  0xc9   : > { %v373_v57 = vmul.f32 %v341_v47, %v341_v47 }
  0xca   : > { %v451_v58 = vsel %vm179_vm0, %v371_v53, 0.0  ;;  %v454_v5 = vsel %vm179_vm0, %v372_v50, 0.0 }
  0xcb   : > { %446 = vadd.xlane.f32.xlu0 %v445_v52  ;;  %452 = vadd.xlane.f32.xlu2 %v451_v58  ;;  %v263_v59 = vpop.xlane.xlu0 %262  ;;  %v457_v62 = vsel %vm179_vm0, %v373_v57, 0.0  ;;  %v266_v63 = vpop.xlane.xlu1 %265 }
  0xcc   : > { %v310_v3 = vmul.f32 %v1325_v15, %v263_v59  ;;  %v269_v30 = vpop.xlane.xlu2 %268  ;;  %458 = vadd.xlane.f32.xlu1 %v457_v62  ;;  %v311_v48 = vmul.f32 %v1325_v15, %v266_v63 }
  0xcd   : > { %v312_v49 = vmul.f32 %v1325_v15, %v269_v30 }
  0xce   : > { %v342_v32 = vsub.f32 %v1301_v54, %v310_v3  ;;  %v343_v4 = vsub.f32 %v1304_v55, %v311_v48 }
  0xcf   : > { %v344_v31 = vsub.f32 %v1307_v56, %v312_v49 }
  0xd0   : > { %v374_v9 = vmul.f32 %v342_v32, %v342_v32  ;;  %v375_v56 = vmul.f32 %v343_v4, %v343_v4 }
  0xd1   : > { %v376_v10 = vmul.f32 %v344_v31, %v344_v31 }
  0xd2   : > { %v460_v11 = vsel %vm179_vm0, %v374_v9, 0.0  ;;  %v463_v23 = vsel %vm179_vm0, %v375_v56, 0.0 }
  0xd3   : > { %455 = vadd.xlane.f32.xlu0 %v454_v5  ;;  %461 = vadd.xlane.f32.xlu2 %v460_v11  ;;  %v272_v16 = vpop.xlane.xlu0 %271  ;;  %v466_v17 = vsel %vm179_vm0, %v376_v10, 0.0  ;;  %v275_v19 = vpop.xlane.xlu1 %274  ;;  %v1456_v11 = vld [vmem:[%s2057_s1] ss:$0 sm:$0xff] }
  0xd4   : > { %v313_v21 = vmul.f32 %v1325_v15, %v272_v16  ;;  %467 = vadd.xlane.f32.xlu1 %v466_v17  ;;  %v314_v54 = vmul.f32 %v1325_v15, %v275_v19 }
  0xd6   : > { %v345_v55 = vsub.f32 %v1316_v60, %v313_v21  ;;  %v346_v22 = vsub.f32 %v1319_v61, %v314_v54 }
  0xd8   : > { %v377_v27 = vmul.f32 %v345_v55, %v345_v55  ;;  %v378_v38 = vmul.f32 %v346_v22, %v346_v22 }
  0xda   : > { %v469_v36 = vsel %vm179_vm0, %v377_v27, 0.0  ;;  %v472_v37 = vsel %vm179_vm0, %v378_v38, 0.0 }
  0xdb   : > { %464 = vadd.xlane.f32.xlu0 %v463_v23  ;;  %470 = vadd.xlane.f32.xlu2 %v469_v36 }
  0xe3   : > { %473 = vadd.xlane.f32.xlu0 %v472_v37 }
  0xfe   : > { %v387_v28 = vpop.xlane.xlu1 %386  ;;  %v381_v29 = vpop.xlane.xlu2 %380 }
  0xff   : > { %v477_v33 = vmul.f32 %v387_v28, %v1325_v15  ;;  %v475_v34 = vmul.f32 %v381_v29, %v1325_v15 }
 0x101   : > { %v509_v60 = vadd.f32 1e-05, %v477_v33  ;;  %v507_v35 = vadd.f32 1e-05, %v475_v34 }
 0x103   : > { %1038 = vrsqrt.f32 %v509_v60  ;;  %vm565_vm2 = vweird.f32 %v509_v60  ;;  %vm545_vm4 = vweird.f32 %v507_v35 }
 0x104   : > { %1040 = vrsqrt.f32 %v507_v35 }
 0x106   : > { %v390_v61 = vpop.xlane.xlu2 %389  ;;  %v384_v39 = vpop.xlane.xlu0 %383 }
 0x107   : > { %v478_v40 = vmul.f32 %v390_v61, %v1325_v15  ;;  %v476_v41 = vmul.f32 %v384_v39, %v1325_v15  ;;  %v396_v24 = vpop.xlane.xlu1 %395 }
 0x108   : > { %v480_v26 = vmul.f32 %v396_v24, %v1325_v15 }
 0x109   : > { %v1039_v25 = vpop.eup %1038  ;;  %v1428_v45 = vadd.f32 1e-05, %v478_v40  ;;  %v1430_v42 = vadd.f32 1e-05, %v476_v41 }
 0x10a   : > { %v1041_v44 = vpop.eup %1040  ;;  %v560_v43 = vmul.f32 %v1039_v25, %v509_v60  ;;  %v1432_v46 = vadd.f32 1e-05, %v480_v26  ;;  %vm566_vm3 = vweird.f32 %v1039_v25 }
 0x10b   : > { %v540_v47 = vmul.f32 %v1041_v44, %v507_v35  ;;  %1042 = vrsqrt.f32 %v1428_v45  ;;  %vm546_vm5 = vweird.f32 %v1041_v44  ;;  %vm575_vm6 = vweird.f32 %v1428_v45  ;;  %vm567_vm7 = vmor %vm565_vm2, %vm566_vm3 }
 0x10c   : > { %v561_v51 = vmul.f32 %v1039_v25, %v560_v43  ;;  %1044 = vrsqrt.f32 %v1430_v42  ;;  %vm547_vm8 = vmor %vm545_vm4, %vm546_vm5  ;;  %vm595_vm9 = vweird.f32 %v1432_v46  ;;  %vm555_vm14 = vweird.f32 %v1430_v42 }
 0x10d   : > { %v541_v52 = vmul.f32 %v1041_v44, %v540_v47  ;;  %1046 = vrsqrt.f32 %v1432_v46 }
 0x10e   : > { %v562_v53 = vmul.f32 0.5, %v561_v51  ;;  %v399_v57 = vpop.xlane.xlu2 %398  ;;  %v393_v58 = vpop.xlane.xlu0 %392 }
 0x10f   : > { %v542_v59 = vmul.f32 0.5, %v541_v52  ;;  %v481_v62 = vmul.f32 %v399_v57, %v1325_v15  ;;  %v479_v63 = vmul.f32 %v393_v58, %v1325_v15  ;;  %v405_v3 = vpop.xlane.xlu1 %404 }
 0x110   : > { %v563_v30 = vsub.f32 1.5, %v562_v53  ;;  %v483_v48 = vmul.f32 %v405_v3, %v1325_v15 }
 0x111   : > { %v1440_v50 = vpop.eup %1042  ;;  %v543_v49 = vsub.f32 1.5, %v542_v59  ;;  %v1442_v32 = vadd.f32 1e-05, %v481_v62  ;;  %v1449_v9 = vadd.f32 1e-05, %v479_v63 }
 0x112   : > { %v1444_v31 = vpop.eup %1044  ;;  %v564_v4 = vmul.f32 %v1039_v25, %v563_v30  ;;  %v570_v5 = vmul.f32 %v1440_v50, %v1428_v45  ;;  %v1462_v19 = vadd.f32 1e-05, %v483_v48  ;;  %vm576_vm10 = vweird.f32 %v1440_v50 }
 0x113   : > { %v1451_v10 = vpop.eup %1046  ;;  %v544_v16 = vmul.f32 %v1041_v44, %v543_v49  ;;  %v550_v17 = vmul.f32 %v1444_v31, %v1430_v42  ;;  %1048 = vrsqrt.f32 %v1442_v32  ;;  %vm556_vm11 = vweird.f32 %v1444_v31  ;;  %vm577_vm13 = vmor %vm575_vm6, %vm576_vm10 }
 0x114   : > { %v568_v21 = vsel %vm567_vm7, %v1039_v25, %v564_v4  ;;  %v571_v54 = vmul.f32 %v1440_v50, %v570_v5  ;;  %v590_v56 = vmul.f32 %v1451_v10, %v1432_v46  ;;  %1050 = vrsqrt.f32 %v1449_v9  ;;  %vm557_vm2 = vmor %vm555_vm14, %vm556_vm11 }
 0x115   : > { %v862_v55 = vmul.f32 %v568_v21, %v1166_v0  ;;  %v548_v22 = vsel %vm547_vm8, %v1041_v44, %v544_v16  ;;  %v551_v23 = vmul.f32 %v1444_v31, %v550_v17  ;;  %1052 = vrsqrt.f32 %v1462_v19 }
 0x116   : > { %v860_v27 = vmul.f32 %v548_v22, %v1169_v1  ;;  %v572_v36 = vmul.f32 0.5, %v571_v54  ;;  %v591_v38 = vmul.f32 %v1451_v10, %v590_v56  ;;  %v408_v0 = vpop.xlane.xlu2 %407  ;;  %v402_v37 = vpop.xlane.xlu0 %401  ;;  %vm596_vm12 = vweird.f32 %v1451_v10 }
 0x117   : > { %v897_v28 = vmul.f32 %v1456_v11, %v862_v55  ;;  %v552_v29 = vmul.f32 0.5, %v551_v23  ;;  %v414_v33 = vpop.xlane.xlu1 %413  ;;  %v484_v39 = vmul.f32 %v408_v0, %v1325_v15  ;;  %v482_v40 = vmul.f32 %v402_v37, %v1325_v15  ;;  %vm1505_vm15 = vmor %vm595_vm9, %vm596_vm12 }
 0x118   : > { %v895_v34 = vmul.f32 %v1456_v11, %v860_v27  ;;  %v573_v1 = vsub.f32 1.5, %v572_v36  ;;  %v592_v60 = vmul.f32 0.5, %v591_v38  ;;  %v486_v41 = vmul.f32 %v414_v33, %v1325_v15 }
 0x119   : > { %v1049_v35 = vpop.eup %1048  ;;  %929 = vst.msk [vmem:[%s1478_s20 + $0x10] sm:$0xff] %vm179_vm0, %v897_v28  ;;  %v553_v61 = vsub.f32 1.5, %v552_v29  ;;  %vm605_vm1 = vweird.f32 %v1442_v32  ;;  %v1510_v47 = vadd.f32 1e-05, %v484_v39  ;;  %v1516_v42 = vadd.f32 1e-05, %v482_v40 }
 0x11a   : > { %927 = vst.msk [vmem:[%s1478_s20] sm:$0xff] %vm179_vm0, %v895_v34  ;;  %v574_v24 = vmul.f32 %v1440_v50, %v573_v1  ;;  %v593_v26 = vsub.f32 1.5, %v592_v60  ;;  %v600_v25 = vmul.f32 %v1049_v35, %v1442_v32  ;;  %v1051_v51 = vpop.eup %1050  ;;  %v1521_v62 = vadd.f32 1e-05, %v486_v41 }
 0x11b   : > { %v554_v44 = vmul.f32 %v1444_v31, %v553_v61  ;;  %v1053_v46 = vpop.eup %1052  ;;  %v580_v59 = vmul.f32 %v1051_v51, %v1449_v9  ;;  %vm606_vm3 = vweird.f32 %v1049_v35  ;;  %1054 = vrsqrt.f32 %v1510_v47 }
 0x11c   : > { %v578_v45 = vsel %vm577_vm13, %v1440_v50, %v574_v24  ;;  %v594_v52 = vmul.f32 %v1451_v10, %v593_v26  ;;  %v601_v53 = vmul.f32 %v1049_v35, %v600_v25  ;;  %v620_v48 = vmul.f32 %v1053_v46, %v1462_v19  ;;  %vm607_vm6 = vmor %vm605_vm1, %vm606_vm3 }
 0x11d   : > { %v863_v57 = vmul.f32 %v578_v45, %v1181_v6  ;;  %v558_v58 = vsel %vm557_vm2, %v1444_v31, %v554_v44  ;;  %v581_v4 = vmul.f32 %v1051_v51, %v580_v59  ;;  %vm625_vm4 = vweird.f32 %v1462_v19 }
 0x11e   : > { %v861_v63 = vmul.f32 %v558_v58, %v1184_v7  ;;  %v598_v3 = vsel %vm1505_vm15, %v1451_v10, %v594_v52  ;;  %v602_v30 = vmul.f32 0.5, %v601_v53  ;;  %v417_v50 = vpop.xlane.xlu2 %416  ;;  %v411_v49 = vpop.xlane.xlu0 %410  ;;  %v621_v17 = vmul.f32 %v1053_v46, %v620_v48  ;;  %v1104_v48 = vld [vmem:[%s1163_s15 + $0x70] sm:$0xff] }
 0x11f   : > { %v898_v6 = vmul.f32 %v1456_v11, %v863_v57  ;;  %v865_v31 = vmul.f32 %v598_v3, %v1187_v8  ;;  %v423_v5 = vpop.xlane.xlu1 %422  ;;  %v582_v21 = vmul.f32 0.5, %v581_v4  ;;  %1056 = vrsqrt.f32 %v1516_v42 }
 0x120   : > { %v896_v7 = vmul.f32 %v1456_v11, %v861_v63  ;;  %v603_v16 = vsub.f32 1.5, %v602_v30  ;;  %v622_v54 = vmul.f32 0.5, %v621_v17  ;;  %vm626_vm5 = vweird.f32 %v1053_v46 }
 0x121   : > { %930 = vst.msk [vmem:[%s1478_s20 + $0x18] sm:$0xff] %vm179_vm0, %v898_v6  ;;  %v900_v10 = vmul.f32 %v1456_v11, %v865_v31  ;;  %1058 = vrsqrt.f32 %v1521_v62  ;;  %v583_v56 = vsub.f32 1.5, %v582_v21  ;;  %vm586_vm7 = vweird.f32 %v1051_v51  ;;  %vm1552_vm9 = vmor %vm625_vm4, %vm626_vm5  ;;  %v1556_v37 = vpop.eup %1054 }
 0x122   : > { %928 = vst.msk [vmem:[%s1478_s20 + $0x8] sm:$0xff] %vm179_vm0, %v896_v7  ;;  %v604_v8 = vmul.f32 %v1049_v35, %v603_v16  ;;  %v487_v55 = vmul.f32 %v417_v50, %v1325_v15  ;;  %v485_v22 = vmul.f32 %v411_v49, %v1325_v15  ;;  %v623_v27 = vsub.f32 1.5, %v622_v54 }
 0x123   : > { %932 = vst.msk [vmem:[%s1478_s20 + $0x28] sm:$0xff] %vm179_vm0, %v900_v10  ;;  %v489_v36 = vmul.f32 %v423_v5, %v1325_v15  ;;  %v584_v0 = vmul.f32 %v1051_v51, %v583_v56  ;;  %vm585_vm8 = vweird.f32 %v1449_v9  ;;  %v630_v9 = vmul.f32 %v1556_v37, %v1510_v47 }
 0x124   : > { %v608_v23 = vsel %vm607_vm6, %v1049_v35, %v604_v8  ;;  %vm587_vm10 = vmor %vm585_vm8, %vm586_vm7  ;;  %v624_v28 = vmul.f32 %v1053_v46, %v623_v27  ;;  %v1558_v29 = vadd.f32 1e-05, %v487_v55  ;;  %v1563_v19 = vadd.f32 1e-05, %v485_v22 }
 0x125   : > { %v866_v38 = vmul.f32 %v608_v23, %v1196_v12  ;;  %v1057_v1 = vpop.eup %1056  ;;  %v588_v60 = vsel %vm587_vm10, %v1051_v51, %v584_v0  ;;  %v1571_v41 = vadd.f32 1e-05, %v489_v36  ;;  %v631_v26 = vmul.f32 %v1556_v37, %v630_v9 }
 0x126   : > { %v426_v33 = vpop.xlane.xlu2 %425  ;;  %v420_v34 = vpop.xlane.xlu0 %419  ;;  %v864_v61 = vmul.f32 %v588_v60, %v1172_v2  ;;  %v628_v39 = vsel %vm1552_vm9, %v1053_v46, %v624_v28  ;;  %v610_v40 = vmul.f32 %v1057_v1, %v1516_v42  ;;  %vm635_vm11 = vweird.f32 %v1510_v47 }
 0x127   : > { %v901_v12 = vmul.f32 %v1456_v11, %v866_v38  ;;  %v1565_v35 = vpop.eup %1058  ;;  %v868_v24 = vmul.f32 %v628_v39, %v1202_v14  ;;  %v432_v25 = vpop.xlane.xlu1 %431  ;;  %vm655_vm12 = vweird.f32 %v1521_v62  ;;  %1060 = vrsqrt.f32 %v1558_v29  ;;  %v1105_v39 = vld [vmem:[%s1163_s15 + $0x78] sm:$0xff] }
 0x128   : > { %v650_v2 = vmul.f32 %v1565_v35, %v1521_v62  ;;  %v899_v44 = vmul.f32 %v1456_v11, %v864_v61  ;;  %v611_v43 = vmul.f32 %v1057_v1, %v610_v40  ;;  %v632_v45 = vmul.f32 0.5, %v631_v26 }
 0x129   : > { %933 = vst.msk [vmem:[%s1478_s20 + $0x30] sm:$0xff] %vm179_vm0, %v901_v12  ;;  %v903_v51 = vmul.f32 %v1456_v11, %v868_v24  ;;  %1062 = vrsqrt.f32 %v1563_v19  ;;  %vm636_vm13 = vweird.f32 %v1556_v37  ;;  %vm656_vm14 = vweird.f32 %v1565_v35 }
 0x12a   : > { %v651_v14 = vmul.f32 %v1565_v35, %v650_v2  ;;  %931 = vst.msk [vmem:[%s1478_s20 + $0x20] sm:$0xff] %vm179_vm0, %v899_v44  ;;  %v612_v52 = vmul.f32 0.5, %v611_v43  ;;  %1064 = vrsqrt.f32 %v1571_v41  ;;  %v633_v53 = vsub.f32 1.5, %v632_v45  ;;  %vm1599_vm1 = vmor %vm635_vm11, %vm636_vm13 }
 0x12b   : > { %935 = vst.msk [vmem:[%s1478_s20 + $0x40] sm:$0xff] %vm179_vm0, %v903_v51  ;;  %v490_v57 = vmul.f32 %v426_v33, %v1325_v15  ;;  %v488_v58 = vmul.f32 %v420_v34, %v1325_v15  ;;  %vm616_vm15 = vweird.f32 %v1057_v1  ;;  %v492_v63 = vmul.f32 %v432_v25, %v1325_v15  ;;  %vm1611_vm4 = vmor %vm655_vm12, %vm656_vm14  ;;  %v1102_v51 = vld [vmem:[%s1163_s15 + $0x60] sm:$0xff] }
 0x12c   : > { %v652_v46 = vmul.f32 0.5, %v651_v14  ;;  %v613_v59 = vsub.f32 1.5, %v612_v52  ;;  %v634_v30 = vmul.f32 %v1556_v37, %v633_v53  ;;  %vm615_vm2 = vweird.f32 %v1516_v42 }
 0x12d   : > { %vm665_vm3 = vweird.f32 %v1558_v29  ;;  %v1605_v49 = vpop.eup %1060  ;;  %vm685_vm5 = vweird.f32 %v1571_v41  ;;  %v1616_v47 = vadd.f32 1e-05, %v490_v57  ;;  %v1618_v4 = vadd.f32 1e-05, %v488_v58  ;;  %vm617_vm6 = vmor %vm615_vm2, %vm616_vm15 }
 0x12e   : > { %v435_v3 = vpop.xlane.xlu2 %434  ;;  %v653_v50 = vsub.f32 1.5, %v652_v46  ;;  %v614_v6 = vmul.f32 %v1057_v1, %v613_v59  ;;  %v429_v42 = vpop.xlane.xlu0 %428  ;;  %v638_v7 = vsel %vm1599_vm1, %v1556_v37, %v634_v30  ;;  %v660_v16 = vmul.f32 %v1605_v49, %v1558_v29  ;;  %v1103_v46 = vld [vmem:[%s1163_s15 + $0x50] sm:$0xff] }
 0x12f   : > { %v1620_v5 = vpop.eup %1062  ;;  %v1629_v17 = vadd.f32 1e-05, %v492_v63  ;;  %v869_v21 = vmul.f32 %v638_v7, %v1211_v18  ;;  %v493_v56 = vmul.f32 %v435_v3, %v1325_v15  ;;  %v441_v18 = vpop.xlane.xlu1 %440  ;;  %1066 = vrsqrt.f32 %v1616_v47 }
 0x130   : > { %v654_v62 = vmul.f32 %v1565_v35, %v653_v50  ;;  %v1631_v10 = vpop.eup %1064  ;;  %v618_v8 = vsel %vm617_vm6, %v1057_v1, %v614_v6  ;;  %v640_v54 = vmul.f32 %v1620_v5, %v1563_v19  ;;  %v661_v23 = vmul.f32 %v1605_v49, %v660_v16 }
 0x131   : > { %v867_v55 = vmul.f32 %v618_v8, %v1199_v13  ;;  %v680_v27 = vmul.f32 %v1631_v10, %v1571_v41  ;;  %v904_v36 = vmul.f32 %v1456_v11, %v869_v21  ;;  %v491_v13 = vmul.f32 %v429_v42, %v1325_v15 }
 0x132   : > { %v658_v22 = vsel %vm1611_vm4, %v1565_v35, %v654_v62  ;;  %v641_v0 = vmul.f32 %v1620_v5, %v640_v54  ;;  %v662_v37 = vmul.f32 0.5, %v661_v23  ;;  %vm666_vm7 = vweird.f32 %v1605_v49 }
 0x133   : > { %v871_v38 = vmul.f32 %v658_v22, %v1217_v20  ;;  %v902_v32 = vmul.f32 %v1456_v11, %v867_v55  ;;  %v681_v28 = vmul.f32 %v1631_v10, %v680_v27  ;;  %936 = vst.msk [vmem:[%s1478_s20 + $0x48] sm:$0xff] %vm179_vm0, %v904_v36  ;;  %1068 = vrsqrt.f32 %v1618_v4  ;;  %vm1672_vm10 = vmor %vm665_vm3, %vm666_vm7 }
 0x134   : > { %v642_v34 = vmul.f32 0.5, %v641_v0  ;;  %v663_v20 = vsub.f32 1.5, %v662_v37  ;;  %vm686_vm8 = vweird.f32 %v1631_v10  ;;  %1070 = vrsqrt.f32 %v1629_v17 }
 0x135   : > { %v906_v33 = vmul.f32 %v1456_v11, %v871_v38  ;;  %934 = vst.msk [vmem:[%s1478_s20 + $0x38] sm:$0xff] %vm179_vm0, %v902_v32  ;;  %v682_v1 = vmul.f32 0.5, %v681_v28  ;;  %vm646_vm9 = vweird.f32 %v1620_v5  ;;  %v1663_v60 = vadd.f32 1e-05, %v493_v56  ;;  %vm1681_vm12 = vmor %vm685_vm5, %vm686_vm8  ;;  %v1687_v25 = vpop.eup %1066 }
 0x136   : > { %v643_v12 = vsub.f32 1.5, %v642_v34  ;;  %v1665_v9 = vadd.f32 1e-05, %v491_v13  ;;  %v444_v35 = vpop.xlane.xlu2 %443  ;;  %v664_v61 = vmul.f32 %v1605_v49, %v663_v20  ;;  %v495_v24 = vmul.f32 %v441_v18, %v1325_v15  ;;  %v438_v29 = vpop.xlane.xlu0 %437 }
 0x137   : > { %938 = vst.msk [vmem:[%s1478_s20 + $0x58] sm:$0xff] %vm179_vm0, %v906_v33  ;;  %v683_v40 = vsub.f32 1.5, %v682_v1  ;;  %vm645_vm11 = vweird.f32 %v1563_v19  ;;  %vm695_vm13 = vweird.f32 %v1616_v47  ;;  %1072 = vrsqrt.f32 %v1663_v60  ;;  %v450_v3 = vpop.xlane.xlu1 %449 }
 0x138   : > { %v644_v26 = vmul.f32 %v1620_v5, %v643_v12  ;;  %v668_v44 = vsel %vm1672_vm10, %v1605_v49, %v664_v61  ;;  %vm647_vm14 = vmor %vm645_vm11, %vm646_vm9  ;;  %1074 = vrsqrt.f32 %v1665_v9  ;;  %v1696_v41 = vadd.f32 1e-05, %v495_v24 }
 0x139   : > { %v684_v19 = vmul.f32 %v1631_v10, %v683_v40  ;;  %v1698_v43 = vpop.eup %1068  ;;  %v872_v45 = vmul.f32 %v1102_v51, %v668_v44  ;;  %v690_v52 = vmul.f32 %v1687_v25, %v1616_v47  ;;  %vm715_vm15 = vweird.f32 %v1629_v17 }
 0x13a   : > { %v648_v14 = vsel %vm647_vm14, %v1620_v5, %v644_v26  ;;  %v1705_v53 = vpop.eup %1070  ;;  %v670_v59 = vmul.f32 %v1698_v43, %v1618_v4  ;;  %vm675_vm1 = vweird.f32 %v1618_v4  ;;  %v496_v63 = vmul.f32 %v444_v35, %v1325_v15 }
 0x13b   : > { %v870_v57 = vmul.f32 %v1103_v46, %v648_v14  ;;  %v688_v58 = vsel %vm1681_vm12, %v1631_v10, %v684_v19  ;;  %v907_v30 = vmul.f32 %v1456_v11, %v872_v45  ;;  %v691_v49 = vmul.f32 %v1687_v25, %v690_v52 }
 0x13c   : > { %v874_v50 = vmul.f32 %v1104_v48, %v688_v58  ;;  %v710_v6 = vmul.f32 %v1705_v53, %v1629_v17  ;;  %vm696_vm2 = vweird.f32 %v1687_v25  ;;  %v671_v42 = vmul.f32 %v1698_v43, %v670_v59 }
 0x13d   : > { %v905_v31 = vmul.f32 %v1456_v11, %v870_v57  ;;  %vm725_vm3 = vweird.f32 %v1663_v60  ;;  %1076 = vrsqrt.f32 %v1696_v41  ;;  %v1725_v5 = vpop.eup %1072  ;;  %939 = vst.msk [vmem:[%s1478_s20 + $0x60] sm:$0xff] %vm179_vm0, %v907_v30  ;;  %v692_v62 = vmul.f32 0.5, %v691_v49  ;;  %vm1756_vm10 = vmor %vm695_vm13, %vm696_vm2 }
 0x13e   : > { %v909_v7 = vmul.f32 %v1456_v11, %v874_v50  ;;  %vm676_vm4 = vweird.f32 %v1698_v43  ;;  %v711_v16 = vmul.f32 %v1705_v53, %v710_v6  ;;  %v1732_v10 = vpop.eup %1074  ;;  %v672_v21 = vmul.f32 0.5, %v671_v42  ;;  %v453_v23 = vpop.xlane.xlu2 %452 }
 0x13f   : > { %937 = vst.msk [vmem:[%s1478_s20 + $0x50] sm:$0xff] %vm179_vm0, %v905_v31  ;;  %vm716_vm5 = vweird.f32 %v1705_v53  ;;  %v720_v8 = vmul.f32 %v1725_v5, %v1663_v60  ;;  %v1739_v54 = vadd.f32 1e-05, %v496_v63  ;;  %v693_v56 = vsub.f32 1.5, %v692_v62  ;;  %v447_v37 = vpop.xlane.xlu0 %446  ;;  %vm677_vm12 = vmor %vm675_vm1, %vm676_vm4  ;;  %v459_v2 = vpop.xlane.xlu1 %458  ;;  %v1108_v60 = vld [vmem:[%s1163_s15 + $0x90] sm:$0xff]  ;;  %v1109_v31 = vld [vmem:[%s1163_s15 + $0x80] sm:$0xff] }
 0x140   : > { %941 = vst.msk [vmem:[%s1478_s20 + $0x70] sm:$0xff] %vm179_vm0, %v909_v7  ;;  %v712_v55 = vmul.f32 0.5, %v711_v16  ;;  %vm726_vm6 = vweird.f32 %v1725_v5  ;;  %v700_v22 = vmul.f32 %v1732_v10, %v1665_v9  ;;  %vm705_vm7 = vweird.f32 %v1665_v9  ;;  %vm1769_vm11 = vmor %vm715_vm15, %vm716_vm5 }
 0x141   : > { %vm745_vm8 = vweird.f32 %v1696_v41  ;;  %v673_v27 = vsub.f32 1.5, %v672_v21  ;;  %v721_v18 = vmul.f32 %v1725_v5, %v720_v8  ;;  %vm706_vm9 = vweird.f32 %v1732_v10  ;;  %vm727_vm14 = vmor %vm725_vm3, %vm726_vm6 }
 0x142   : > { %1078 = vrsqrt.f32 %v1739_v54  ;;  %v694_v36 = vmul.f32 %v1687_v25, %v693_v56  ;;  %v713_v0 = vsub.f32 1.5, %v712_v55  ;;  %v701_v13 = vmul.f32 %v1732_v10, %v700_v22  ;;  %vm707_vm15 = vmor %vm705_vm7, %vm706_vm9 }
 0x143   : > { %v494_v32 = vmul.f32 %v438_v29, %v1325_v15  ;;  %v1762_v28 = vpop.eup %1076  ;;  %v674_v33 = vmul.f32 %v1698_v43, %v673_v27  ;;  %v722_v34 = vmul.f32 0.5, %v721_v18  ;;  %v498_v20 = vmul.f32 %v450_v3, %v1325_v15  ;;  %v1106_v29 = vld [vmem:[%s1163_s15 + $0x68] sm:$0xff]  ;;  %v1110_v27 = vld [vmem:[%s1163_s15 + $0xa0] sm:$0xff] }
 0x144   : > { %v499_v1 = vmul.f32 %v453_v23, %v1325_v15  ;;  %v698_v12 = vsel %vm1756_vm10, %v1687_v25, %v694_v36  ;;  %v714_v17 = vmul.f32 %v1705_v53, %v713_v0  ;;  %v702_v35 = vmul.f32 0.5, %v701_v13 }
 0x145   : > { %v740_v61 = vmul.f32 %v1762_v28, %v1696_v41  ;;  %v875_v40 = vmul.f32 %v1105_v39, %v698_v12  ;;  %v678_v24 = vsel %vm677_vm12, %v1698_v43, %v674_v33  ;;  %v723_v26 = vsub.f32 1.5, %v722_v34  ;;  %v1107_v43 = vld [vmem:[%s1163_s15 + $0x88] sm:$0xff] }
 0x146   : > { %vm746_vm13 = vweird.f32 %v1762_v28  ;;  %v873_v25 = vmul.f32 %v1106_v29, %v678_v24  ;;  %v718_v4 = vsel %vm1769_vm11, %v1705_v53, %v714_v17  ;;  %v703_v44 = vsub.f32 1.5, %v702_v35  ;;  %v462_v6 = vpop.xlane.xlu2 %461  ;;  %v1111_v35 = vld [vmem:[%s1163_s15 + $0xa8] sm:$0xff] }
 0x147   : > { %v741_v19 = vmul.f32 %v1762_v28, %v740_v61  ;;  %v910_v45 = vmul.f32 %v1456_v11, %v875_v40  ;;  %v877_v14 = vmul.f32 %v1107_v43, %v718_v4  ;;  %v724_v52 = vmul.f32 %v1725_v5, %v723_v26  ;;  %vm1829_vm1 = vmor %vm745_vm8, %vm746_vm13  ;;  %v456_v8 = vpop.xlane.xlu0 %455  ;;  %v468_v13 = vpop.xlane.xlu1 %467 }
 0x148   : > { %v1793_v51 = vpop.eup %1078  ;;  %v1798_v46 = vadd.f32 1e-05, %v494_v32  ;;  %v908_v57 = vmul.f32 %v1456_v11, %v873_v25  ;;  %v704_v53 = vmul.f32 %v1732_v10, %v703_v44  ;;  %v1835_v7 = vadd.f32 1e-05, %v499_v1 }
 0x149   : > { %v742_v58 = vmul.f32 0.5, %v741_v19  ;;  %v750_v59 = vmul.f32 %v1793_v51, %v1739_v54  ;;  %942 = vst.msk [vmem:[%s1478_s20 + $0x78] sm:$0xff] %vm179_vm0, %v910_v45  ;;  %v912_v63 = vmul.f32 %v1456_v11, %v877_v14  ;;  %v728_v3 = vsel %vm727_vm14, %v1725_v5, %v724_v52 }
 0x14a   : > { %1080 = vrsqrt.f32 %v1798_v46  ;;  %940 = vst.msk [vmem:[%s1478_s20 + $0x68] sm:$0xff] %vm179_vm0, %v908_v57  ;;  %v878_v30 = vmul.f32 %v1108_v60, %v728_v3  ;;  %v708_v48 = vsel %vm707_vm15, %v1732_v10, %v704_v53  ;;  %v1833_v5 = vadd.f32 1e-05, %v498_v20 }
 0x14b   : > { %v743_v50 = vsub.f32 1.5, %v742_v58  ;;  %v751_v49 = vmul.f32 %v1793_v51, %v750_v59  ;;  %944 = vst.msk [vmem:[%s1478_s20 + $0x88] sm:$0xff] %vm179_vm0, %v912_v63  ;;  %v876_v42 = vmul.f32 %v1109_v31, %v708_v48  ;;  %v497_v21 = vmul.f32 %v447_v37, %v1325_v15 }
 0x14c   : > { %v913_v62 = vmul.f32 %v1456_v11, %v878_v30  ;;  %vm755_vm2 = vweird.f32 %v1739_v54  ;;  %vm756_vm3 = vweird.f32 %v1793_v51  ;;  %1082 = vrsqrt.f32 %v1833_v5 }
 0x14d   : > { %v744_v16 = vmul.f32 %v1762_v28, %v743_v50  ;;  %v752_v10 = vmul.f32 0.5, %v751_v49  ;;  %v911_v41 = vmul.f32 %v1456_v11, %v876_v42  ;;  %1084 = vrsqrt.f32 %v1835_v7  ;;  %vm757_vm4 = vmor %vm755_vm2, %vm756_vm3  ;;  %v1112_v50 = vld [vmem:[%s1163_s15 + $0x98] sm:$0xff] }
 0x14e   : > { %945 = vst.msk [vmem:[%s1478_s20 + $0x90] sm:$0xff] %vm179_vm0, %v913_v62  ;;  %v1850_v22 = vadd.f32 1e-05, %v497_v21  ;;  %v501_v36 = vmul.f32 %v459_v2, %v1325_v15  ;;  %v502_v38 = vmul.f32 %v462_v6, %v1325_v15  ;;  %v500_v0 = vmul.f32 %v456_v8, %v1325_v15  ;;  %v471_v24 = vpop.xlane.xlu2 %470 }
 0x14f   : > { %v748_v56 = vsel %vm1829_vm1, %v1762_v28, %v744_v16  ;;  %v753_v55 = vsub.f32 1.5, %v752_v10  ;;  %943 = vst.msk [vmem:[%s1478_s20 + $0x80] sm:$0xff] %vm179_vm0, %v911_v41  ;;  %v504_v12 = vmul.f32 %v468_v13, %v1325_v15  ;;  %vm735_vm5 = vweird.f32 %v1798_v46  ;;  %v465_v43 = vpop.xlane.xlu0 %464 }
 0x150   : > { %v1852_v23 = vpop.eup %1080  ;;  %v880_v18 = vmul.f32 %v1110_v27, %v748_v56  ;;  %1086 = vrsqrt.f32 %v1850_v22  ;;  %v1869_v33 = vadd.f32 1e-05, %v501_v36  ;;  %v1871_v47 = vadd.f32 1e-05, %v502_v38 }
 0x151   : > { %v754_v32 = vmul.f32 %v1793_v51, %v753_v55  ;;  %v730_v37 = vmul.f32 %v1852_v23, %v1798_v46  ;;  %v1875_v1 = vadd.f32 1e-05, %v500_v0  ;;  %vm775_vm6 = vweird.f32 %v1833_v5 }
 0x152   : > { %v915_v28 = vmul.f32 %v1456_v11, %v880_v18  ;;  %v1878_v17 = vpop.eup %1082  ;;  %1088 = vrsqrt.f32 %v1869_v33  ;;  %vm785_vm7 = vweird.f32 %v1835_v7  ;;  %vm736_vm8 = vweird.f32 %v1852_v23  ;;  %v1113_v18 = vld [vmem:[%s1163_s15 + $0xb8] sm:$0xff] }
 0x153   : > { %v758_v34 = vsel %vm757_vm4, %v1793_v51, %v754_v32  ;;  %v731_v20 = vmul.f32 %v1852_v23, %v730_v37  ;;  %v1886_v54 = vpop.eup %1084  ;;  %v770_v40 = vmul.f32 %v1878_v17, %v1833_v5  ;;  %1090 = vrsqrt.f32 %v1871_v47  ;;  %vm737_vm13 = vmor %vm735_vm5, %vm736_vm8  ;;  %v1114_v32 = vld [vmem:[%s1163_s15 + $0xc0] sm:$0xff] }
 0x154   : > { %947 = vst.msk [vmem:[%s1478_s20 + $0xa0] sm:$0xff] %vm179_vm0, %v915_v28  ;;  %v881_v61 = vmul.f32 %v1111_v35, %v758_v34  ;;  %v780_v2 = vmul.f32 %v1886_v54, %v1835_v7  ;;  %1092 = vrsqrt.f32 %v1875_v1  ;;  %vm805_vm9 = vweird.f32 %v1869_v33 }
 0x155   : > { %v732_v39 = vmul.f32 0.5, %v731_v20  ;;  %v771_v4 = vmul.f32 %v1878_v17, %v770_v40  ;;  %v1901_v44 = vadd.f32 1e-05, %v504_v12  ;;  %vm776_vm10 = vweird.f32 %v1878_v17 }
 0x156   : > { %v916_v26 = vmul.f32 %v1456_v11, %v881_v61  ;;  %v1897_v29 = vpop.eup %1086  ;;  %v781_v19 = vmul.f32 %v1886_v54, %v780_v2  ;;  %vm765_vm11 = vweird.f32 %v1850_v22  ;;  %v505_v45 = vmul.f32 %v471_v24, %v1325_v15  ;;  %vm1938_vm1 = vmor %vm775_vm6, %vm776_vm10  ;;  %v1115_v61 = vld [vmem:[%s1163_s15 + $0xb0] sm:$0xff] }
 0x157   : > { %v733_v25 = vsub.f32 1.5, %v732_v39  ;;  %v760_v51 = vmul.f32 %v1897_v29, %v1850_v22  ;;  %v772_v52 = vmul.f32 0.5, %v771_v4  ;;  %vm786_vm12 = vweird.f32 %v1886_v54  ;;  %v474_v24 = vpop.xlane.xlu0 %473 }
 0x158   : > { %948 = vst.msk [vmem:[%s1478_s20 + $0xa8] sm:$0xff] %vm179_vm0, %v916_v26  ;;  %1094 = vrsqrt.f32 %v1901_v44  ;;  %v1914_v57 = vpop.eup %1088  ;;  %v782_v53 = vmul.f32 0.5, %v781_v19  ;;  %vm766_vm14 = vweird.f32 %v1897_v29  ;;  %vm815_vm15 = vweird.f32 %v1871_v47  ;;  %vm787_vm5 = vmor %vm785_vm7, %vm786_vm12  ;;  %v1116_v19 = vld [vmem:[%s1163_s15 + $0xd0] sm:$0xff] }
 0x159   : > { %v734_v14 = vmul.f32 %v1852_v23, %v733_v25  ;;  %v761_v58 = vmul.f32 %v1897_v29, %v760_v51  ;;  %v1923_v59 = vadd.f32 1e-05, %v505_v45  ;;  %v1925_v63 = vpop.eup %1090  ;;  %v773_v60 = vsub.f32 1.5, %v772_v52  ;;  %vm767_vm7 = vmor %vm765_vm11, %vm766_vm14 }
 0x15a   : > { %v800_v30 = vmul.f32 %v1914_v57, %v1869_v33  ;;  %v503_v46 = vmul.f32 %v465_v43, %v1325_v15  ;;  %v1931_v48 = vpop.eup %1092  ;;  %v783_v31 = vsub.f32 1.5, %v782_v53  ;;  %v810_v9 = vmul.f32 %v1925_v63, %v1871_v47  ;;  %v1117_v47 = vld [vmem:[%s1163_s15 + $0xd8] sm:$0xff] }
 0x15b   : > { %v738_v3 = vsel %vm737_vm13, %v1852_v23, %v734_v14  ;;  %v762_v42 = vmul.f32 0.5, %v761_v58  ;;  %v774_v62 = vmul.f32 %v1878_v17, %v773_v60  ;;  %vm806_vm2 = vweird.f32 %v1914_v57  ;;  %v1118_v58 = vld [vmem:[%s1163_s15 + $0xc8] sm:$0xff] }
 0x15c   : > { %v879_v49 = vmul.f32 %v1112_v50, %v738_v3  ;;  %v801_v16 = vmul.f32 %v1914_v57, %v800_v30  ;;  %v790_v5 = vmul.f32 %v1931_v48, %v1875_v1  ;;  %vm795_vm3 = vweird.f32 %v1875_v1  ;;  %vm1983_vm8 = vmor %vm805_vm9, %vm806_vm2 }
 0x15d   : > { %v784_v21 = vmul.f32 %v1886_v54, %v783_v31  ;;  %v763_v8 = vsub.f32 1.5, %v762_v42  ;;  %v811_v41 = vmul.f32 %v1925_v63, %v810_v9  ;;  %vm835_vm4 = vweird.f32 %v1901_v44 }
 0x15e   : > { %v914_v10 = vmul.f32 %v1456_v11, %v879_v49  ;;  %v1954_v56 = vpop.eup %1094  ;;  %v778_v55 = vsel %vm1938_vm1, %v1878_v17, %v774_v62  ;;  %v802_v23 = vmul.f32 0.5, %v801_v16  ;;  %vm816_vm6 = vweird.f32 %v1925_v63 }
 0x15f   : > { %v791_v27 = vmul.f32 %v1931_v48, %v790_v5  ;;  %v883_v36 = vmul.f32 %v1113_v18, %v778_v55  ;;  %v788_v38 = vsel %vm787_vm5, %v1886_v54, %v784_v21  ;;  %v764_v0 = vmul.f32 %v1897_v29, %v763_v8  ;;  %vm817_vm11 = vmor %vm815_vm15, %vm816_vm6  ;;  %v1120_v18 = vld [vmem:[%s1163_s15 + $0xf0] sm:$0xff] }
 0x160   : > { %946 = vst.msk [vmem:[%s1478_s20 + $0x98] sm:$0xff] %vm179_vm0, %v914_v10  ;;  %v812_v13 = vmul.f32 0.5, %v811_v41  ;;  %v884_v37 = vmul.f32 %v1114_v32, %v788_v38  ;;  %v803_v7 = vsub.f32 1.5, %v802_v23  ;;  %v830_v34 = vmul.f32 %v1954_v56, %v1901_v44  ;;  %v1119_v44 = vld [vmem:[%s1163_s15 + $0xe8] sm:$0xff]  ;;  %v1121_v32 = vld [vmem:[%s1163_s15 + $0xe0] sm:$0xff] }
 0x161   : > { %v792_v28 = vmul.f32 0.5, %v791_v27  ;;  %v918_v20 = vmul.f32 %v1456_v11, %v883_v36  ;;  %v768_v12 = vsel %vm767_vm7, %v1897_v29, %v764_v0  ;;  %vm796_vm10 = vweird.f32 %v1931_v48 }
 0x162   : > { %v813_v22 = vsub.f32 1.5, %v812_v13  ;;  %v919_v35 = vmul.f32 %v1456_v11, %v884_v37  ;;  %v882_v54 = vmul.f32 %v1115_v61, %v768_v12  ;;  %v804_v39 = vmul.f32 %v1914_v57, %v803_v7  ;;  %vm797_vm12 = vmor %vm795_vm3, %vm796_vm10 }
 0x163   : > { %v793_v40 = vsub.f32 1.5, %v792_v28  ;;  %950 = vst.msk [vmem:[%s1478_s20 + $0xb8] sm:$0xff] %vm179_vm0, %v918_v20  ;;  %v831_v26 = vmul.f32 %v1954_v56, %v830_v34  ;;  %vm836_vm9 = vweird.f32 %v1954_v56  ;;  %1096 = vrsqrt.f32 %v1923_v59  ;;  %v1122_v20 = vld [vmem:[%s1163_s15 + $0xf8] sm:$0xff] }
 0x164   : > { %v814_v33 = vmul.f32 %v1925_v63, %v813_v22  ;;  %951 = vst.msk [vmem:[%s1478_s20 + $0xc0] sm:$0xff] %vm179_vm0, %v919_v35  ;;  %v917_v2 = vmul.f32 %v1456_v11, %v882_v54  ;;  %v808_v29 = vsel %vm1983_vm8, %v1914_v57, %v804_v39  ;;  %v535_v4 = vadd.f32 1e-05, %v503_v46  ;;  %vm837_vm13 = vmor %vm835_vm4, %vm836_vm9 }
 0x165   : > { %v794_v25 = vmul.f32 %v1931_v48, %v793_v40  ;;  %v886_v51 = vmul.f32 %v1116_v19, %v808_v29  ;;  %v832_v43 = vmul.f32 0.5, %v831_v26  ;;  %v506_v14 = vmul.f32 %v474_v24, %v1325_v15 }
 0x166   : > { %v818_v45 = vsel %vm817_vm11, %v1925_v63, %v814_v33  ;;  %949 = vst.msk [vmem:[%s1478_s20 + $0xb0] sm:$0xff] %vm179_vm0, %v917_v2  ;;  %1098 = vrsqrt.f32 %v535_v4  ;;  %vm845_vm14 = vweird.f32 %v1923_v59  ;;  %vm825_vm3 = vweird.f32 %v535_v4 }
 0x167   : > { %v887_v52 = vmul.f32 %v1117_v47, %v818_v45  ;;  %v798_v57 = vsel %vm797_vm12, %v1931_v48, %v794_v25  ;;  %v921_v53 = vmul.f32 %v1456_v11, %v886_v51  ;;  %v833_v1 = vsub.f32 1.5, %v832_v43 }
 0x168   : > { %v885_v63 = vmul.f32 %v1118_v58, %v798_v57  ;;  %v538_v3 = vadd.f32 1e-05, %v506_v14 }
 0x169   : > { %v922_v60 = vmul.f32 %v1456_v11, %v887_v52  ;;  %v1097_v15 = vpop.eup %1096  ;;  %953 = vst.msk [vmem:[%s1478_s20 + $0xd0] sm:$0xff] %vm179_vm0, %v921_v53  ;;  %v834_v46 = vmul.f32 %v1954_v56, %v833_v1 }
 0x16a   : > { %v920_v30 = vmul.f32 %v1456_v11, %v885_v63  ;;  %1100 = vrsqrt.f32 %v538_v3  ;;  %v840_v48 = vmul.f32 %v1097_v15, %v1923_v59  ;;  %vm846_vm15 = vweird.f32 %v1097_v15 }
 0x16b   : > { %954 = vst.msk [vmem:[%s1478_s20 + $0xd8] sm:$0xff] %vm179_vm0, %v922_v60  ;;  %v838_v50 = vsel %vm837_vm13, %v1954_v56, %v834_v46  ;;  %vm847_vm1 = vmor %vm845_vm14, %vm846_vm15  ;;  %vm855_vm6 = vweird.f32 %v538_v3 }
 0x16c   : > { %952 = vst.msk [vmem:[%s1478_s20 + $0xc8] sm:$0xff] %vm179_vm0, %v920_v30  ;;  %v1099_v49 = vpop.eup %1098  ;;  %v889_v6 = vmul.f32 %v1119_v44, %v838_v50  ;;  %v841_v31 = vmul.f32 %v1097_v15, %v840_v48 }
 0x16d   : > { %v820_v42 = vmul.f32 %v1099_v49, %v535_v4  ;;  %vm826_vm2 = vweird.f32 %v1099_v49 }
 0x16e   : > { %v924_v9 = vmul.f32 %v1456_v11, %v889_v6  ;;  %v842_v62 = vmul.f32 0.5, %v841_v31  ;;  %vm827_vm4 = vmor %vm825_vm3, %vm826_vm2 }
 0x16f   : > { %v821_v5 = vmul.f32 %v1099_v49, %v820_v42 }
 0x170   : > { %v1101_v16 = vpop.eup %1100  ;;  %956 = vst.msk [vmem:[%s1478_s20 + $0xe8] sm:$0xff] %vm179_vm0, %v924_v9  ;;  %v843_v10 = vsub.f32 1.5, %v842_v62 }
 0x171   : > { %v850_v21 = vmul.f32 %v1101_v16, %v538_v3  ;;  %v822_v8 = vmul.f32 0.5, %v821_v5  ;;  %vm856_vm5 = vweird.f32 %v1101_v16 }
 0x172   : > { %v844_v41 = vmul.f32 %v1097_v15, %v843_v10  ;;  %vm857_vm7 = vmor %vm855_vm6, %vm856_vm5 }
 0x173   : > { %v851_v56 = vmul.f32 %v1101_v16, %v850_v21  ;;  %v823_v55 = vsub.f32 1.5, %v822_v8 }
 0x174   : > { %v848_v23 = vsel %vm847_vm1, %v1097_v15, %v844_v41 }
 0x175   : > { %v852_v27 = vmul.f32 0.5, %v851_v56  ;;  %v890_v36 = vmul.f32 %v1120_v18, %v848_v23  ;;  %v824_v38 = vmul.f32 %v1099_v49, %v823_v55 }
 0x177   : > { %v853_v59 = vsub.f32 1.5, %v852_v27  ;;  %v925_v0 = vmul.f32 %v1456_v11, %v890_v36  ;;  %v828_v13 = vsel %vm827_vm4, %v1099_v49, %v824_v38 }
 0x178   : > { %v888_v37 = vmul.f32 %v1121_v32, %v828_v13 }
 0x179   : > { %v854_v7 = vmul.f32 %v1101_v16, %v853_v59  ;;  %957 = vst.msk [vmem:[%s1478_s20 + $0xf0] sm:$0xff] %vm179_vm0, %v925_v0 }
 0x17a   : > { %v923_v28 = vmul.f32 %v1456_v11, %v888_v37 }
 0x17b   : > { %v858_v34 = vsel %vm857_vm7, %v1101_v16, %v854_v7 }
 0x17c   : > { %v891_v12 = vmul.f32 %v1122_v20, %v858_v34  ;;  %955 = vst.msk [vmem:[%s1478_s20 + $0xe0] sm:$0xff] %vm179_vm0, %v923_v28 }
 0x17e   : > { %v926_v17 = vmul.f32 %v1456_v11, %v891_v12 }
 0x180   : > { %958 = vst.msk [vmem:[%s1478_s20 + $0xf8] sm:$0xff] %vm179_vm0, %v926_v17 }
 0x181 PF: > { %s12_s9 = sadd.s32 1, %s1129_s9  }
 0x182   : > { %p9_p4 = scmp.ge.s32.totalorder %s12_s9, 4  }
 0x184   :  { %11 = sbr.rel (!%p9_p4) target bundleno = 1 (0x1), region = 58 }

</bundles_post_ra>
